<compile_context>
chip_gen: v6e
topology: v6e:2x2x1
jax: 0.10.0
libtpu: 0.0.40
codegen_flags: <defaults>
</compile_context>

<pallas_src>
import jax
import jax.numpy as jnp
from jax.experimental import pallas as pl
from jax.experimental.pallas import tpu as pltpu


def _round_up(a, m):
    return ((a + m - 1) // m) * m


def _tight_tile(size, granule, tile_max):
    """Largest tile <= ~tile_max (multiple of `granule`) that minimises padding.

    Returns (tile, padded_size) with padded_size = n_tiles * tile >= size.
    """
    tile_max = max(tile_max, granule)
    padded = _round_up(size, granule)
    n_tiles = -(-padded // tile_max)                 # ceil
    tile = _round_up(-(-padded // n_tiles), granule)  # ceil, re-rounded to granule
    return tile, n_tiles * tile


# ----------------------------- kernels --------------------------------------


def _decoder_kernel_acc(x_ref, w_ref, b_ref, o_ref, acc_ref):
    """One (tm, tn) output tile; grid axis 2 walks the H reduction."""
    k = pl.program_id(2)
    prod = jnp.dot(x_ref[...], w_ref[...], preferred_element_type=jnp.float32)

    @pl.when(k == 0)
    def _first():
        # Write the first partial product directly: saves one full accumulator
        # zero-store plus one load/add/store pass per output tile.
        acc_ref[...] = prod

    @pl.when(k > 0)
    def _accumulate():
        acc_ref[...] += prod

    @pl.when(k == pl.num_programs(2) - 1)
    def _finalize():
        # Bias is added exactly once per output tile (last reduction step).
        o_ref[...] = (acc_ref[...] + b_ref[...]).astype(o_ref.dtype)


def _decoder_kernel_single(x_ref, w_ref, b_ref, o_ref):
    """Whole H reduction in one k tile: no scratch accumulator, 2-D grid."""
    o_ref[...] = (
        jnp.dot(x_ref[...], w_ref[...], preferred_element_type=jnp.float32)
        + b_ref[...]
    ).astype(o_ref.dtype)


# ----------------------------- wrapper ---------------------------------------


def prepare_decoder(w, b, *, tn=1024, tk=2048):
    """One-time pad + bf16 cast of the decoder parameters (do NOT call per step).

    w: [H, V] float32   (PyTorch nn.Linear weight [V, H] pre-transposed)
    b: [V] or [1, V] float32
    Returns a dict of prepared (padded, bf16) weight, f32 bias and tile sizes.
    """
    H, V = w.shape
    tn, Vp = _tight_tile(V, 128, tn)
    tk, Hp = _tight_tile(H, 128, tk)
    wp = jnp.pad(
        jnp.asarray(w, jnp.float32), ((0, Hp - H), (0, Vp - V))
    ).astype(jnp.bfloat16)
    bp = jnp.pad(jnp.asarray(b, jnp.float32).reshape(1, V), ((0, 0), (0, Vp - V)))
    return {"wp": wp, "bp": bp, "tn": tn, "tk": tk, "H": H, "V": V}


def net_forward(x, params, *, tm=1024, out_dtype=jnp.float32):
    """Net.forward with decoder = Linear(H, V).

    x:      [N, H] float32 (or bf16)
    params: output of prepare_decoder(w, b)
    returns [N, V] in `out_dtype` (f32 by default to match the torch reference;
    pass jnp.bfloat16 if the consumer tolerates bf16 logits).
    """
    N, H = x.shape
    assert H == params["H"], f"input hidden {H} != decoder hidden {params['H']}"
    wp, bp = params["wp"], params["bp"]
    tn, tk, V = params["tn"], params["tk"], params["V"]
    Hp, Vp = wp.shape

    # Tight row tiling: avoid near-2x padding when N is just over a multiple.
    tm, Np = _tight_tile(N, 8, tm)

    xp = x
    if (Np, Hp) != (N, H):
        xp = jnp.pad(xp, ((0, Np - N), (0, Hp - H)))
    if xp.dtype != jnp.bfloat16:
        xp = xp.astype(jnp.bfloat16)

    n_i, n_j, n_k = Np // tm, Vp // tn, Hp // tk

    # Actual traffic: W re-streamed once per i-tile, x once per j-tile, + output.
    cost = pl.CostEstimate(
        flops=2 * Np * Hp * Vp,
        transcendentals=0,
        bytes_accessed=int(
            n_i * Hp * Vp * 2 + n_j * Np * Hp * 2 + n_i * Vp * 4 + Np * Vp * 4
        ),
    )

    # Deeper prefetch on the dominant W stream only when the kernel is likely
    # memory-bound (small tm) and the stream is long enough to benefit.
    deep_w = (tm < 512) and (n_k >= 3)
    w_bufs = 3 if deep_w else 2

    # Scoped-VMEM limit sized from the working set; capped at 48 MiB so it
    # always leaves headroom on v7x's 64 MiB physical VMEM per TC.
    working_set = (
        2 * tm * tk * 2                    # x tiles (bf16, double-buffered)
        + w_bufs * tk * tn * 2             # W tiles (bf16)
        + 2 * tn * 4                       # bias tiles
        + 2 * tm * tn * 4                  # output tiles (f32)
        + (tm * tn * 4 if n_k > 1 else 0)  # accumulator scratch
    )
    vmem_limit = min(48 * 1024 * 1024,
                     max(32 * 1024 * 1024, int(working_set * 1.25)))

    if n_k == 1:
        out = pl.pallas_call(
            _decoder_kernel_single,
            out_shape=jax.ShapeDtypeStruct((Np, Vp), out_dtype),
            grid_spec=pltpu.PrefetchScalarGridSpec(
                num_scalar_prefetch=0,
                grid=(n_i, n_j),
                in_specs=[
                    pl.BlockSpec((tm, tk), lambda i, j: (i, 0)),   # x tile
                    pl.BlockSpec((tk, tn), lambda i, j: (0, j)),   # W tile
                    pl.BlockSpec((1, tn), lambda i, j: (0, j)),    # bias tile
                ],
                out_specs=pl.BlockSpec((tm, tn), lambda i, j: (i, j)),
            ),
            compiler_params=pltpu.CompilerParams(
                dimension_semantics=("parallel", "parallel"),
                vmem_limit_bytes=vmem_limit,
            ),
            cost_estimate=cost,
        )(xp, wp, bp)
    else:
        w_spec_kwargs = {"pipeline_mode": pl.Buffered(3)} if deep_w else {}
        out = pl.pallas_call(
            _decoder_kernel_acc,
            out_shape=jax.ShapeDtypeStruct((Np, Vp), out_dtype),
            grid_spec=pltpu.PrefetchScalarGridSpec(
                num_scalar_prefetch=0,
                grid=(n_i, n_j, n_k),
                in_specs=[
                    pl.BlockSpec((tm, tk), lambda i, j, k: (i, k)),   # x tile
                    pl.BlockSpec((tk, tn), lambda i, j, k: (k, j),    # W tile
                                 **w_spec_kwargs),
                    pl.BlockSpec((1, tn), lambda i, j, k: (0, j)),    # bias tile
                ],
                out_specs=pl.BlockSpec((tm, tn), lambda i, j, k: (i, j)),
                scratch_shapes=[pltpu.VMEM((tm, tn), jnp.float32)],
            ),
            compiler_params=pltpu.CompilerParams(
                # N / V independent -> shard across TCs; H accumulates -> last,
                # "arbitrary".
                dimension_semantics=("parallel", "parallel", "arbitrary"),
                vmem_limit_bytes=vmem_limit,
            ),
            cost_estimate=cost,
        )(xp, wp, bp)

    if (Np, Vp) != (N, V):
        out = out[:N, :V]
    return out


if __name__ == "__main__":
    key = jax.random.PRNGKey(0)

    # --- Test 1: toy decoder-head shapes (batch*seq=8, hidden=32, vocab=128).
    N, H, V = 8, 32, 128
    kx, kw, kb, k2 = jax.random.split(key, 4)
    x = jax.random.normal(kx, (N, H), dtype=jnp.float32)
    w_torch = jax.random.normal(kw, (V, H), dtype=jnp.float32) * 0.05  # [V, H]
    b = jax.random.normal(kb, (V,), dtype=jnp.float32) * 0.05
    w = w_torch.T  # [H, V]

    params = prepare_decoder(w, b)      # pad + bf16 cast ONCE, not per forward
    out = jax.block_until_ready(net_forward(x, params))
    ref = x @ w + b
    assert out.shape == (N, V)
    assert jnp.allclose(out, ref, atol=2e-2, rtol=2e-2), float(
        jnp.max(jnp.abs(out - ref))
    )

    # --- Test 2: force a (2,2,2) grid to exercise the accumulator
    #     first-write/accumulate/finalize path and bias-once-per-tile logic.
    N2, H2, V2 = 16, 256, 256
    ka, kb2, kc = jax.random.split(k2, 3)
    x2 = jax.random.normal(ka, (N2, H2), dtype=jnp.float32)
    w2 = jax.random.normal(kb2, (H2, V2), dtype=jnp.float32) * 0.05
    b2 = jax.random.normal(kc, (V2,), dtype=jnp.float32) * 0.05
    params2 = prepare_decoder(w2, b2, tn=128, tk=128)
    out2 = jax.block_until_ready(net_forward(x2, params2, tm=8))
    ref2 = x2 @ w2 + b2
    assert jnp.allclose(out2, ref2, atol=5e-2, rtol=5e-2), float(
        jnp.max(jnp.abs(out2 - ref2))
    )

    # --- Test 3: default large-tile path (single reduction step, no scratch
    #     accumulator, whole H in one k tile).
    N3, H3, V3 = 512, 512, 1024
    kd, ke, kf = jax.random.split(ka, 3)
    x3 = jax.random.normal(kd, (N3, H3), dtype=jnp.float32)
    w3 = jax.random.normal(ke, (H3, V3), dtype=jnp.float32) * 0.02
    b3 = jax.random.normal(kf, (V3,), dtype=jnp.float32) * 0.02
    params3 = prepare_decoder(w3, b3)
    out3 = jax.block_until_ready(net_forward(x3, params3))
    ref3 = x3 @ w3 + b3
    assert jnp.allclose(out3, ref3, atol=5e-2, rtol=5e-2), float(
        jnp.max(jnp.abs(out3 - ref3))
    )

    print("KERNEL_OK")
</pallas_src>

<mosaic_0001>
module attributes {stable_mosaic.version = 11 : i64} {
  func.func @_decoder_kernel_single(%arg0: i32, %arg1: i32, %arg2: memref<8x128xbf16, #tpu.memory_space<vmem>>, %arg3: memref<128x128xbf16, #tpu.memory_space<vmem>>, %arg4: memref<1x128xf32, #tpu.memory_space<vmem>>, %arg5: memref<8x128xf32, #tpu.memory_space<vmem>>) attributes {dimension_semantics = [#tpu.dimension_semantics<parallel>, #tpu.dimension_semantics<parallel>], iteration_bounds = array<i64: 1, 1>, scalar_prefetch = 0 : i64, scratch_operands = 0 : i64, tpu.core_type = #tpu.core_type<tc>, window_params = [{transform_indices = @transform_0, window_bounds = array<i64: 8, 128>}, {transform_indices = @transform_1, window_bounds = array<i64: 128, 128>}, {transform_indices = @transform_2, window_bounds = array<i64: 1, 128>}, {transform_indices = @transform_3, window_bounds = array<i64: 8, 128>}]} {
    %c0 = arith.constant 0 : index
    %c0_0 = arith.constant 0 : index
    %0 = vector.load %arg2[%c0, %c0_0] : memref<8x128xbf16, #tpu.memory_space<vmem>>, vector<8x128xbf16>
    %c0_1 = arith.constant 0 : index
    %c0_2 = arith.constant 0 : index
    %1 = vector.load %arg3[%c0_1, %c0_2] : memref<128x128xbf16, #tpu.memory_space<vmem>>, vector<128x128xbf16>
    %cst = arith.constant dense<0.000000e+00> : vector<8x128xf32>
    %2 = tpu.matmul %0, %1, %cst {dimension_numbers = #tpu.dot_dimension_numbers<[1], [0], [0], [1], [0, 0, 1, 1], [], []>} : vector<8x128xbf16>, vector<128x128xbf16>, vector<8x128xf32> -> vector<8x128xf32>
    %c0_3 = arith.constant 0 : index
    %c0_4 = arith.constant 0 : index
    %3 = vector.load %arg4[%c0_3, %c0_4] : memref<1x128xf32, #tpu.memory_space<vmem>>, vector<1x128xf32>
    %4 = vector.broadcast %3 : vector<1x128xf32> to vector<8x128xf32>
    %5 = arith.addf %2, %4 : vector<8x128xf32>
    %c0_5 = arith.constant 0 : index
    %c0_6 = arith.constant 0 : index
    %6 = vector.load %arg5[%c0_5, %c0_6] : memref<8x128xf32, #tpu.memory_space<vmem>>, vector<8x128xf32>
    tpu.vector_store %arg5[%c0_5, %c0_6], %5 {strides = array<i32>} : memref<8x128xf32, #tpu.memory_space<vmem>>, vector<8x128xf32>,
    return
  }
  func.func @transform_0(%arg0: i32, %arg1: i32) -> (i32, i32) {
    %c0_i32 = arith.constant 0 : i32
    %c0_i32_0 = arith.constant 0 : i32
    return %arg0, %c0_i32 : i32, i32
  }
  func.func @transform_1(%arg0: i32, %arg1: i32) -> (i32, i32) {
    %c0_i32 = arith.constant 0 : i32
    %c0_i32_0 = arith.constant 0 : i32
    return %c0_i32, %arg1 : i32, i32
  }
  func.func @transform_2(%arg0: i32, %arg1: i32) -> (i32, i32) {
    %c0_i32 = arith.constant 0 : i32
    %c0_i32_0 = arith.constant 0 : i32
    return %c0_i32, %arg1 : i32, i32
  }
  func.func @transform_3(%arg0: i32, %arg1: i32) -> (i32, i32) {
    %c0_i32 = arith.constant 0 : i32
    return %arg0, %arg1 : i32, i32
  }
}

</mosaic_0001>

<bundles_post_ra>
// kernel: tpu_custom_call.1
= control target key start
LH: loop header
LB: loop body
LE: loop exit
PB: predicated region body
PF: predicated region fallthrough
CT: control target
= control target key end

     0   :  { %8 = vsyncpa [#allocation3], 0  ;;  %s329_s0 = inlined_call_operand.hbm [shape: bf16[8,128], index: 0, kind: input, shape index: {}]   ;;  %s330_s1 = inlined_call_operand.hbm [shape: bf16[128,128], index: 1, kind: input, shape index: {}]   ;;  %s331_s2 = inlined_call_operand.vmem [shape: f32[1,128], index: 2, kind: input, shape index: {}]   ;;  %s332_s3 = inlined_call_operand.hbm [shape: f32[8,128], index: 3, kind: output, shape index: {}]  }
   0x1   :  { %9 = vsyncpa [#allocation6], 0 }
   0x2   :  { %10 = vsyncpa [#allocation4], 0  ;;  %s290_s12 = smov [#allocation2]   ;;  %s291_s14 = smov [#allocation5]  }
   0x3   :  { %s17_s13 = sshll.u32 %s290_s12, 4  ;;  %s26_s15 = sshll.u32 %s291_s14, 4  ;;  %s18_s13 = int_to_ptr.vmem [resolvable:$true] %s17_s13  ;;  %s27_s15 = int_to_ptr.vmem [resolvable:$true] %s26_s15 }
   0x4   :  { %s232_s16 = scalar_lea.vmem %s18_s13, 64  ;;  %p237_p1 = scmp.lt.s32.totalorder %s18_s13, %s18_s13 }
   0x5   :  { %p233_p0 = scmp.ne.s32.totalorder %s18_s13, %s232_s16  ;;  %p238_p2 = scmp.lt.s32.totalorder %s232_s16, %s232_s16 }
   0x7   :  { %p239_p3 = por %p238_p2, %p237_p1 }
   0x9   :  { %p240_p4 = pnand %p239_p3, %p233_p0 }
   0xb   :  { %243 = shalt.err (!%p240_p4)
}
   0xc   :  { %20 = dma.hbm_to_vmem [thread:$0]  %s329_s0, 64, %s18_s13, [#allocation3]  }
   0xd   :  { %s252_s19 = scalar_lea.vmem %s27_s15, 1024  ;;  %p257_p6 = scmp.lt.s32.totalorder %s27_s15, %s27_s15 }
   0xe   :  { %p253_p5 = scmp.ne.s32.totalorder %s27_s15, %s252_s19  ;;  %p258_p7 = scmp.lt.s32.totalorder %s252_s19, %s252_s19 }
  0x10   :  { %p259_p8 = por %p258_p7, %p257_p6 }
  0x12   :  { %p260_p9 = pnand %p259_p8, %p253_p5 }
  0x14   :  { %263 = shalt.err (!%p260_p9)
}
  0x15   :  { %s292_s20 = smov 64   ;;  %s293_s21 = smov 4  }
  0x16   :  { %32 = dma.hbm_to_vmem [thread:$0]  %s330_s1, 1024, %s27_s15, [#allocation6], %s292_s20, %s292_s20, %s293_s21  }
  0x17   :  { %284 = dma.done.wait [#allocation3], 64  }
  0x18   :  { %285 = vsyncadd [#allocation3], 4294967232 }
  0x19   :  { %286 = dma.done.wait [#allocation6], 1024  }
  0x1a   :  { %287 = vsyncadd [#allocation6], 4294966272  ;;  %v294_v0 = vmov 0.0   ;;  %vm295_vm0 = vmmov 0   ;;  %v216_v1 = vld [vmem:[#allocation5 + $0x38] sm:$0xff]   ;;  %v217_v2 = vld [vmem:[#allocation5 + $0x30] sm:$0xff]  }
  0x1b   :  { %189 = vmatprep.subr.bf16.mxu0 %v294_v0  ;;  %205 = vmatprep.mubr.msk.bf16.mxu0 %vm295_vm0, %v294_v0  ;;  %v218_v3 = vld [vmem:[#allocation5 + $0x28] sm:$0xff]   ;;  %v219_v4 = vld [vmem:[#allocation5 + $0x20] sm:$0xff]   ;;  %v220_v5 = vld [vmem:[#allocation5 + $0x18] sm:$0xff]   ;;  %s296_s24 = smov [#allocation7]  }
  0x1c   :  { %190 = vmatpush3.bf16.msra.mxu0 %v216_v1  ;;  %v221_v6 = vld [vmem:[#allocation5 + $0x10] sm:$0xff]   ;;  %v222_v7 = vld [vmem:[#allocation5 + $0x8] sm:$0xff]   ;;  %v223_v8 = vld [vmem:[#allocation5] sm:$0xff]   ;;  %s161_s25 = sshll.u32 %s296_s24, 4  ;;  %s162_s25 = int_to_ptr.vmem [resolvable:$true] %s161_s25 }
  0x1d   :  { %191 = vmatprep.subr.bf16.mxu0 %v294_v0  ;;  %v42_v9 = vld [vmem:[#allocation2] sm:$0xf]  ;;  %s264_s26 = scalar_lea.vmem %s162_s25, 128  ;;  %p269_p11 = scmp.lt.s32.totalorder %s162_s25, %s162_s25 }
  0x1e   :  { %v171_v10 = vld [vmem:[%s331_s2] ss:$0 sm:$0xff]  ;;  %p265_p10 = scmp.ne.s32.totalorder %s162_s25, %s264_s26  ;;  %p270_p12 = scmp.lt.s32.totalorder %s264_s26, %s264_s26 }
  0x20   :  { %192 = vmatpush3.bf16.msra.mxu0 %v217_v2  ;;  %p271_p13 = por %p270_p12, %p269_p11 }
  0x21   :  { %193 = vmatprep.subr.bf16.mxu0 %v294_v0 }
  0x22   :  { %p272_p0 = pnand %p271_p13, %p265_p10 }
  0x24   :  { %194 = vmatpush3.bf16.msra.mxu0 %v218_v3 }
  0x25   :  { %195 = vmatprep.subr.bf16.mxu0 %v294_v0 }
  0x28   :  { %196 = vmatpush3.bf16.msra.mxu0 %v219_v4 }
  0x29   :  { %197 = vmatprep.subr.bf16.mxu0 %v294_v0 }
  0x2c   :  { %198 = vmatpush3.bf16.msra.mxu0 %v220_v5 }
  0x2d   :  { %199 = vmatprep.subr.bf16.mxu0 %v294_v0 }
  0x30   :  { %200 = vmatpush3.bf16.msra.mxu0 %v221_v6 }
  0x31   :  { %201 = vmatprep.subr.bf16.mxu0 %v294_v0 }
  0x34   :  { %202 = vmatpush3.bf16.msra.mxu0 %v222_v7 }
  0x35   :  { %203 = vmatprep.subr.bf16.mxu0 %v294_v0 }
  0x38   :  { %204 = vmatpush3.bf16.msra.mxu0 %v223_v8 }
  0x3b   :  { %206 = vmatmul.mubr.bf16.vlgmr.msra.gmra.mxu0 %v42_v9 }
  0xfb   :  { %v148_v11 = vpop.f32.mrf.mxu0 }
  0xfc   :  { %v149_v12 = vadd.f32 %v171_v10, %v148_v11 }
  0xfd   :  { %v207_v13 = vpop.f32.mrf.mxu0 }
  0xfe   :  { %154 = vst [vmem:[#allocation7] sm:$0xff] %v149_v12 }
  0xff   :  { %v151_v14 = vpop.f32.mrf.mxu0 }
 0x100   :  { %275 = shalt.err (!%p272_p0)
}
 0x101   :  { %164 = dma.vmem_to_hbm [thread:$0]  %s162_s25, 128, %s332_s3, [#allocation4]   ;;  %v208_v15 = vpop.f32.mrf.mxu0 }
 0x102   :  { %288 = dma.done.wait [#allocation4], 128  }
 0x103   :  { %289 = vsyncadd [#allocation4], 4294967168 }
 0x104   :  { %168 = vsyncpa [#allocation3], 1 }
 0x105   :  { %169 = vsyncpa [#allocation6], 1 }
 0x106   :  { %170 = vsyncpa [#allocation4], 1 }

</bundles_post_ra>
